<compile_context>
chip_gen: v6e
topology: v6e:2x2x1
jax: 0.10.0
libtpu: 0.0.40
codegen_flags: <defaults>
</compile_context>

<pallas_src>
import jax
import jax.numpy as jnp
import numpy as np
from jax.experimental import pallas as pl
from jax.experimental.pallas import tpu as pltpu


# ----------------------------------------------------------------------------
# Kernel: grid = (batch tiles [parallel], layers [arbitrary/reduction]).
# Per step: token stats for one layer -> two accumulating (TB, Din)x(Din, Dout)
# MXU matmuls -> on the last layer, add fused bias and emit ctx_shifted.
# ----------------------------------------------------------------------------
def gopro_ctx_kernel(data_ref, ws_ref, wc_ref, b_ref, ctx_ref, out_ref, acc_ref):
    l = pl.program_id(1)
    n_layers = pl.num_programs(1)

    @pl.when(l == 0)
    def _init():
        acc_ref[...] = jnp.zeros_like(acc_ref)

    # ---- AdaIN token statistics for this layer (f32, two-pass variance) ----
    x = data_ref[0]                                  # (TB, L, Din) f32
    L = x.shape[1]
    inv_L = 1.0 / L
    mu = jnp.sum(x, axis=1) * inv_L                  # (TB, Din)
    centered = x - mu[:, None, :]
    ssd = jnp.sum(centered * centered, axis=1)       # (TB, Din)
    sigma = jnp.sqrt((ssd + 2.3e-08) * inv_L)

    style = 0.5 * (mu + sigma)                       # style_projector GAP input
    content = mu                                     # content_projector GAP input

    # ---- fused per-layer matmuls, accumulated over the layer grid axis ----
    wdt = ws_ref.dtype                               # bf16 (or f32) MXU operands
    acc_ref[...] += jnp.dot(style.astype(wdt), ws_ref[0],
                            preferred_element_type=jnp.float32)
    acc_ref[...] += jnp.dot(content.astype(wdt), wc_ref[0],
                            preferred_element_type=jnp.float32)

    # ---- finalize: feat -> ctx_shifted for this batch tile ----
    @pl.when(l == n_layers - 1)
    def _finalize():
        feat = acc_ref[...] + b_ref[...]                              # (TB, Dout)
        out_ref[...] = (ctx_ref[...][None, :, :]
                        + feat[:, None, :]).astype(out_ref.dtype)     # (TB, n_ctx, Dout)


# ----------------------------------------------------------------------------
# Trace-time algebraic folding of style/content Linears + frg 0.5 + rho.
# ----------------------------------------------------------------------------
def fuse_params(params, weight_dtype=jnp.bfloat16):
    scale = 0.5 * params["rho_w"]                                        # (nl,)
    ws_f = (scale[:, None, None] * params["ws"]).astype(weight_dtype)    # (nl, Din, Dout)
    wc_f = (scale[:, None, None] * params["wc"]).astype(weight_dtype)    # (nl, Din, Dout)
    b_f = (jnp.sum(scale[:, None] * (params["bs"] + params["bc"]), axis=0)
           + params["rho_b"][0]).reshape(1, -1).astype(jnp.float32)      # (1, Dout)
    return ws_f, wc_f, b_f


def ctx_shifted_pallas(data, ws_f, wc_f, b_f, ctx, *, tb=32,
                       vmem_limit_bytes=48 * 1024 * 1024):
    n_layers, B, L, Din = data.shape
    Dout = ws_f.shape[-1]
    n_ctx = ctx.shape[0]

    # Batch tile: >= 8 rows (f32 sublane) when possible, and dividing B.
    tb = max(1, min(tb, B))
    while B % tb:
        tb -= 1

    grid = (B // tb, n_layers)   # layer (reduction) axis innermost
    grid_spec = pltpu.PrefetchScalarGridSpec(
        num_scalar_prefetch=0,
        grid=grid,
        in_specs=[
            # data[l, b*tb:(b+1)*tb, :, :] -- contiguous HBM region per step.
            pl.BlockSpec((1, tb, L, Din), lambda b, l: (l, b, 0, 0)),
            # per-layer fused weights: stream + double-buffer, never fully resident.
            pl.BlockSpec((1, Din, Dout), lambda b, l: (l, 0, 0)),
            pl.BlockSpec((1, Din, Dout), lambda b, l: (l, 0, 0)),
            # tiny constant-index inputs (fused bias, ctx).
            pl.BlockSpec((1, Dout), lambda b, l: (0, 0)),
            pl.BlockSpec((n_ctx, Dout), lambda b, l: (0, 0)),
        ],
        out_specs=pl.BlockSpec((tb, n_ctx, Dout), lambda b, l: (b, 0, 0)),
        scratch_shapes=[pltpu.VMEM((tb, Dout), jnp.float32)],
    )
    return pl.pallas_call(
        gopro_ctx_kernel,
        out_shape=jax.ShapeDtypeStruct((B, n_ctx, Dout), jnp.float32),
        grid_spec=grid_spec,
        compiler_params=pltpu.CompilerParams(
            dimension_semantics=("parallel", "arbitrary"),
            vmem_limit_bytes=vmem_limit_bytes,
        ),
    )(data, ws_f, wc_f, b_f, ctx)


def prompt_learner_forward(params, data, *, weight_dtype=jnp.bfloat16, tb=32):
    """Full PromptLearner.forward: returns prompts (B, n_cls, 1+n_ctx+S, D)."""
    ws_f, wc_f, b_f = fuse_params(params, weight_dtype)
    ctx_shifted = ctx_shifted_pallas(data, ws_f, wc_f, b_f, params["ctx"], tb=tb)

    # Static prompt assembly (prefix/suffix do not depend on data): done in XLA per
    # the perf review; at integration time use a persistent aliased template +
    # dynamic_update_slice of the ctx slab to avoid rewriting prefix/suffix.
    B = data.shape[1]
    n_ctx, D = params["ctx"].shape
    n_cls = params["token_prefix"].shape[0]
    S = params["token_suffix"].shape[1]
    prefix = jnp.broadcast_to(params["token_prefix"][None], (B, n_cls, 1, D))
    ctx_b = jnp.broadcast_to(ctx_shifted[:, None], (B, n_cls, n_ctx, D))
    suffix = jnp.broadcast_to(params["token_suffix"][None], (B, n_cls, S, D))
    return jnp.concatenate([prefix, ctx_b, suffix], axis=2)


# ----------------------------------------------------------------------------
# Pure-JAX reference (mirrors the PyTorch forward semantics, unfolded)
# ----------------------------------------------------------------------------
def ref_forward(params, data):
    n_layers, B, L, Din = data.shape
    hi = jax.lax.Precision.HIGHEST
    mu = jnp.sum(data, axis=2) / L
    sigma = jnp.sqrt((jnp.sum((data - mu[:, :, None, :]) ** 2, axis=2) + 2.3e-08) / L)
    style_in = 0.5 * (mu + sigma)
    content_in = mu
    style_out = (jnp.einsum("lbd,lde->lbe", style_in, params["ws"], precision=hi)
                 + params["bs"][:, None, :])
    content_out = (jnp.einsum("lbd,lde->lbe", content_in, params["wc"], precision=hi)
                   + params["bc"][:, None, :])
    sc = 0.5 * (style_out + content_out)                        # (nl, B, Dout)
    feat = jnp.einsum("lbe,l->be", sc, params["rho_w"], precision=hi) + params["rho_b"][0]
    ctx_shifted = params["ctx"][None] + feat[:, None, :]        # (B, n_ctx, D)
    B_, n_ctx, D = ctx_shifted.shape
    n_cls = params["token_prefix"].shape[0]
    S = params["token_suffix"].shape[1]
    prefix = jnp.broadcast_to(params["token_prefix"][None], (B_, n_cls, 1, D))
    ctx_b = jnp.broadcast_to(ctx_shifted[:, None], (B_, n_cls, n_ctx, D))
    suffix = jnp.broadcast_to(params["token_suffix"][None], (B_, n_cls, S, D))
    return jnp.concatenate([prefix, ctx_b, suffix], axis=2)


if __name__ == "__main__":
    key = jax.random.PRNGKey(0)
    n_layers, B, L = 12, 8, 8          # 12 transformer layers (fixed by module)
    Din, Dout = 256, 128               # stand-ins for (768 -> 512), ctx_dim=Dout
    n_ctx, n_cls, T = 4, 3, 16         # context tokens, classes, sequence length
    S = T - 1 - n_ctx

    keys = jax.random.split(key, 10)
    data = jax.random.normal(keys[0], (n_layers, B, L, Din), jnp.float32)
    ws = 0.02 * jax.random.normal(keys[1], (n_layers, Din, Dout), jnp.float32)
    bs = 0.02 * jax.random.normal(keys[2], (n_layers, Dout), jnp.float32)
    wc = 0.02 * jax.random.normal(keys[3], (n_layers, Din, Dout), jnp.float32)
    bc = 0.02 * jax.random.normal(keys[4], (n_layers, Dout), jnp.float32)
    rho_w = 0.1 * jax.random.normal(keys[5], (n_layers,), jnp.float32)
    rho_b = 0.1 * jax.random.normal(keys[6], (1,), jnp.float32)
    ctx = 0.02 * jax.random.normal(keys[7], (n_ctx, Dout), jnp.float32)  # nn.init.normal_(std=0.02)
    token_prefix = jax.random.normal(keys[8], (n_cls, 1, Dout), jnp.float32)
    token_suffix = jax.random.normal(keys[9], (n_cls, S, Dout), jnp.float32)

    params = dict(ws=ws, bs=bs, wc=wc, bc=bc, rho_w=rho_w, rho_b=rho_b, ctx=ctx,
                  token_prefix=token_prefix, token_suffix=token_suffix)

    ref = ref_forward(params, data)

    # 1) f32-weight path: tight correctness check of the kernel semantics.
    fwd_f32 = jax.jit(lambda p, d: prompt_learner_forward(
        p, d, weight_dtype=jnp.float32, tb=8))
    prompts_f32 = jax.block_until_ready(fwd_f32(params, data))
    assert prompts_f32.shape == (B, n_cls, T, Dout)
    np.testing.assert_allclose(np.asarray(prompts_f32), np.asarray(ref),
                               rtol=2e-5, atol=2e-5)

    # 2) bf16-weight path (production config): relaxed tolerance.
    fwd_bf16 = jax.jit(lambda p, d: prompt_learner_forward(
        p, d, weight_dtype=jnp.bfloat16, tb=8))
    prompts_bf16 = jax.block_until_ready(fwd_bf16(params, data))
    np.testing.assert_allclose(np.asarray(prompts_bf16), np.asarray(ref),
                               rtol=2e-2, atol=2e-3)

    print("KERNEL_OK")
</pallas_src>

<mosaic_0001>
module attributes {stable_mosaic.version = 11 : i64} {
  func.func @gopro_ctx_kernel(%arg0: i32, %arg1: i32, %arg2: memref<1x8x8x256xf32, #tpu.memory_space<vmem>>, %arg3: memref<1x256x128xf32, #tpu.memory_space<vmem>>, %arg4: memref<1x256x128xf32, #tpu.memory_space<vmem>>, %arg5: memref<1x128xf32, #tpu.memory_space<vmem>>, %arg6: memref<4x128xf32, #tpu.memory_space<vmem>>, %arg7: memref<8x4x128xf32, #tpu.memory_space<vmem>>, %arg8: memref<8x128xf32, #tpu.memory_space<vmem>>) attributes {dimension_semantics = [#tpu.dimension_semantics<parallel>, #tpu.dimension_semantics<arbitrary>], iteration_bounds = array<i64: 1, 12>, scalar_prefetch = 0 : i64, scratch_operands = 1 : i64, tpu.core_type = #tpu.core_type<tc>, window_params = [{transform_indices = @transform_0, window_bounds = array<i64: 1, 8, 8, 256>}, {transform_indices = @transform_1, window_bounds = array<i64: 1, 256, 128>}, {transform_indices = @transform_2, window_bounds = array<i64: 1, 256, 128>}, {pipeline_mode = #tpu.pipeline_mode<synchronous>, transform_indices = @transform_3, window_bounds = array<i64: 1, 128>}, {pipeline_mode = #tpu.pipeline_mode<synchronous>, transform_indices = @transform_4, window_bounds = array<i64: 4, 128>}, {transform_indices = @transform_5, window_bounds = array<i64: 8, 4, 128>}]} {
    %c0_i32 = arith.constant 0 : i32
    %0 = arith.cmpi eq, %arg1, %c0_i32 : i32
    %1 = arith.extui %0 : i1 to i32
    %c0_i32_0 = arith.constant 0 : i32
    %2 = arith.cmpi ne, %1, %c0_i32_0 : i32
    scf.if %2 {
      %cst_26 = arith.constant 0.000000e+00 : f32
      %36 = vector.broadcast %cst_26 : f32 to vector<8x128xf32>
      %c0_27 = arith.constant 0 : index
      %c0_28 = arith.constant 0 : index
      %37 = vector.load %arg8[%c0_27, %c0_28] : memref<8x128xf32, #tpu.memory_space<vmem>>, vector<8x128xf32>
      tpu.vector_store %arg8[%c0_27, %c0_28], %36 {strides = array<i32>} : memref<8x128xf32, #tpu.memory_space<vmem>>, vector<8x128xf32>,
    } else {
    }
    %c0 = arith.constant 0 : index
    %c0_1 = arith.constant 0 : index
    %c0_2 = arith.constant 0 : index
    %c0_3 = arith.constant 0 : index
    %3 = vector.load %arg2[%c0, %c0_1, %c0_2, %c0_3] : memref<1x8x8x256xf32, #tpu.memory_space<vmem>>, vector<1x8x8x256xf32>
    %4 = vector.shape_cast %3 : vector<1x8x8x256xf32> to vector<8x8x256xf32>
    %cst = arith.constant dense<0.000000e+00> : vector<8x256xf32>
    %5 = vector.multi_reduction <add>, %4, %cst [1] : vector<8x8x256xf32> to vector<8x256xf32>
    %cst_4 = arith.constant 1.250000e-01 : f32
    %6 = vector.broadcast %cst_4 : f32 to vector<8x256xf32>
    %7 = arith.mulf %5, %6 : vector<8x256xf32>
    %8 = vector.shape_cast %7 : vector<8x256xf32> to vector<8x1x256xf32>
    %9 = vector.broadcast %8 : vector<8x1x256xf32> to vector<8x8x256xf32>
    %10 = arith.subf %4, %9 : vector<8x8x256xf32>
    %11 = arith.mulf %10, %10 : vector<8x8x256xf32>
    %cst_5 = arith.constant dense<0.000000e+00> : vector<8x256xf32>
    %12 = vector.multi_reduction <add>, %11, %cst_5 [1] : vector<8x8x256xf32> to vector<8x256xf32>
    %cst_6 = arith.constant 2.300000e-08 : f32
    %13 = vector.broadcast %cst_6 : f32 to vector<8x256xf32>
    %14 = arith.addf %12, %13 : vector<8x256xf32>
    %cst_7 = arith.constant 1.250000e-01 : f32
    %15 = vector.broadcast %cst_7 : f32 to vector<8x256xf32>
    %16 = arith.mulf %14, %15 : vector<8x256xf32>
    %17 = math.sqrt %16 : vector<8x256xf32>
    %18 = arith.addf %7, %17 : vector<8x256xf32>
    %cst_8 = arith.constant 5.000000e-01 : f32
    %19 = vector.broadcast %cst_8 : f32 to vector<8x256xf32>
    %20 = arith.mulf %19, %18 : vector<8x256xf32>
    %c0_9 = arith.constant 0 : index
    %c0_10 = arith.constant 0 : index
    %21 = vector.load %arg8[%c0_9, %c0_10] : memref<8x128xf32, #tpu.memory_space<vmem>>, vector<8x128xf32>
    %c0_11 = arith.constant 0 : index
    %c0_12 = arith.constant 0 : index
    %c0_13 = arith.constant 0 : index
    %22 = vector.load %arg3[%c0_11, %c0_12, %c0_13] : memref<1x256x128xf32, #tpu.memory_space<vmem>>, vector<1x256x128xf32>
    %23 = vector.shape_cast %22 : vector<1x256x128xf32> to vector<256x128xf32>
    %cst_14 = arith.constant dense<0.000000e+00> : vector<8x128xf32>
    %24 = tpu.matmul %20, %23, %cst_14 {dimension_numbers = #tpu.dot_dimension_numbers<[1], [0], [0], [1], [0, 0, 1, 1], [], []>} : vector<8x256xf32>, vector<256x128xf32>, vector<8x128xf32> -> vector<8x128xf32>
    %25 = arith.addf %21, %24 : vector<8x128xf32>
    %c0_15 = arith.constant 0 : index
    %c0_16 = arith.constant 0 : index
    %26 = vector.load %arg8[%c0_15, %c0_16] : memref<8x128xf32, #tpu.memory_space<vmem>>, vector<8x128xf32>
    tpu.vector_store %arg8[%c0_15, %c0_16], %25 {strides = array<i32>} : memref<8x128xf32, #tpu.memory_space<vmem>>, vector<8x128xf32>,
    %c0_17 = arith.constant 0 : index
    %c0_18 = arith.constant 0 : index
    %27 = vector.load %arg8[%c0_17, %c0_18] : memref<8x128xf32, #tpu.memory_space<vmem>>, vector<8x128xf32>
    %c0_19 = arith.constant 0 : index
    %c0_20 = arith.constant 0 : index
    %c0_21 = arith.constant 0 : index
    %28 = vector.load %arg4[%c0_19, %c0_20, %c0_21] : memref<1x256x128xf32, #tpu.memory_space<vmem>>, vector<1x256x128xf32>
    %29 = vector.shape_cast %28 : vector<1x256x128xf32> to vector<256x128xf32>
    %cst_22 = arith.constant dense<0.000000e+00> : vector<8x128xf32>
    %30 = tpu.matmul %7, %29, %cst_22 {dimension_numbers = #tpu.dot_dimension_numbers<[1], [0], [0], [1], [0, 0, 1, 1], [], []>} : vector<8x256xf32>, vector<256x128xf32>, vector<8x128xf32> -> vector<8x128xf32>
    %31 = arith.addf %27, %30 : vector<8x128xf32>
    %c0_23 = arith.constant 0 : index
    %c0_24 = arith.constant 0 : index
    %32 = vector.load %arg8[%c0_23, %c0_24] : memref<8x128xf32, #tpu.memory_space<vmem>>, vector<8x128xf32>
    tpu.vector_store %arg8[%c0_23, %c0_24], %31 {strides = array<i32>} : memref<8x128xf32, #tpu.memory_space<vmem>>, vector<8x128xf32>,
    %c11_i32 = arith.constant 11 : i32
    %33 = arith.cmpi eq, %arg1, %c11_i32 : i32
    %34 = arith.extui %33 : i1 to i32
    %c0_i32_25 = arith.constant 0 : i32
    %35 = arith.cmpi ne, %34, %c0_i32_25 : i32
    scf.if %35 {
      %c0_26 = arith.constant 0 : index
      %c0_27 = arith.constant 0 : index
      %36 = vector.load %arg8[%c0_26, %c0_27] : memref<8x128xf32, #tpu.memory_space<vmem>>, vector<8x128xf32>
      %c0_28 = arith.constant 0 : index
      %c0_29 = arith.constant 0 : index
      %37 = vector.load %arg5[%c0_28, %c0_29] : memref<1x128xf32, #tpu.memory_space<vmem>>, vector<1x128xf32>
      %38 = vector.broadcast %37 : vector<1x128xf32> to vector<8x128xf32>
      %39 = arith.addf %36, %38 : vector<8x128xf32>
      %c0_30 = arith.constant 0 : index
      %c0_31 = arith.constant 0 : index
      %40 = vector.load %arg6[%c0_30, %c0_31] : memref<4x128xf32, #tpu.memory_space<vmem>>, vector<4x128xf32>
      %41 = vector.shape_cast %40 : vector<4x128xf32> to vector<1x4x128xf32>
      %42 = vector.shape_cast %39 : vector<8x128xf32> to vector<8x1x128xf32>
      %43 = vector.broadcast %41 : vector<1x4x128xf32> to vector<8x4x128xf32>
      %44 = vector.broadcast %42 : vector<8x1x128xf32> to vector<8x4x128xf32>
      %45 = arith.addf %43, %44 : vector<8x4x128xf32>
      %c0_32 = arith.constant 0 : index
      %c0_33 = arith.constant 0 : index
      %c0_34 = arith.constant 0 : index
      %46 = vector.load %arg7[%c0_32, %c0_33, %c0_34] : memref<8x4x128xf32, #tpu.memory_space<vmem>>, vector<8x4x128xf32>
      tpu.vector_store %arg7[%c0_32, %c0_33, %c0_34], %45 {strides = array<i32>} : memref<8x4x128xf32, #tpu.memory_space<vmem>>, vector<8x4x128xf32>,
    } else {
    }
    return
  }
  func.func @transform_0(%arg0: i32, %arg1: i32) -> (i32, i32, i32, i32) {
    %c0_i32 = arith.constant 0 : i32
    %c0_i32_0 = arith.constant 0 : i32
    %c0_i32_1 = arith.constant 0 : i32
    return %arg1, %arg0, %c0_i32, %c0_i32_0 : i32, i32, i32, i32
  }
  func.func @transform_1(%arg0: i32, %arg1: i32) -> (i32, i32, i32) {
    %c0_i32 = arith.constant 0 : i32
    %c0_i32_0 = arith.constant 0 : i32
    %c0_i32_1 = arith.constant 0 : i32
    return %arg1, %c0_i32, %c0_i32_0 : i32, i32, i32
  }
  func.func @transform_2(%arg0: i32, %arg1: i32) -> (i32, i32, i32) {
    %c0_i32 = arith.constant 0 : i32
    %c0_i32_0 = arith.constant 0 : i32
    %c0_i32_1 = arith.constant 0 : i32
    return %arg1, %c0_i32, %c0_i32_0 : i32, i32, i32
  }
  func.func @transform_3(%arg0: i32, %arg1: i32) -> (i32, i32) {
    %c0_i32 = arith.constant 0 : i32
    %c0_i32_0 = arith.constant 0 : i32
    %c0_i32_1 = arith.constant 0 : i32
    return %c0_i32, %c0_i32_0 : i32, i32
  }
  func.func @transform_4(%arg0: i32, %arg1: i32) -> (i32, i32) {
    %c0_i32 = arith.constant 0 : i32
    %c0_i32_0 = arith.constant 0 : i32
    %c0_i32_1 = arith.constant 0 : i32
    return %c0_i32, %c0_i32_0 : i32, i32
  }
  func.func @transform_5(%arg0: i32, %arg1: i32) -> (i32, i32, i32) {
    %c0_i32 = arith.constant 0 : i32
    %c0_i32_0 = arith.constant 0 : i32
    %c0_i32_1 = arith.constant 0 : i32
    return %arg0, %c0_i32, %c0_i32_0 : i32, i32, i32
  }
}

</mosaic_0001>

<bundles_post_ra>
// kernel: _lambda_.1
= control target key start
LH: loop header
LB: loop body
LE: loop exit
PB: predicated region body
PF: predicated region fallthrough
CT: control target
= control target key end

     0   :  { %s1434_s18 = smov 0   ;;  %s1436_s19 = smov 0   ;;  %s2016_s0 = inlined_call_operand.vmem [shape: f32[12,8,8,256], index: 0, kind: input, shape index: {}]   ;;  %s2017_s1 = inlined_call_operand.vmem [shape: f32[12,256,128], index: 1, kind: input, shape index: {}]   ;;  %s2018_s2 = inlined_call_operand.vmem [shape: f32[12,256,128], index: 2, kind: input, shape index: {}]   ;;  %s2019_s3 = inlined_call_operand.vmem [shape: f32[1,128], index: 3, kind: input, shape index: {}]   ;;  %s2020_s4 = inlined_call_operand.vmem [shape: f32[4,128], index: 4, kind: input, shape index: {}]   ;;  %s2021_s5 = inlined_call_operand.vmem [shape: f32[8,4,128], index: 5, kind: output, shape index: {}]  }
   0x1   :  { %s1438_s20 = smov 0  }
   0x2 LB: > { %s24_s21 = sadd.s32 1, %s1396_s19  ;;  %p1233_p0 = scmp.ge.s32.totalorder %s1400_s20, 1  ;;  %s1400_s20 = sphi %s1438_s20, %s15_s20   ;;  %s1396_s19 = sphi %s1436_s19, %s2040_s19   ;;  %s1392_s18 = sphi %s1434_s18, %s2039_s18  }
   0x3   : > { %p25_p1 = scmp.ge.s32.totalorder %s24_s21, 12  ;;  %p227_p2 = scmp.lt.s32.totalorder %s1400_s20, 13 }
   0x5   : > { %s2042_s21 = smov (%p25_p1, %s24_s21), 0  ;;  %p228_p3 = pnand %p1233_p0, %p227_p2 }
   0x6   : > { %p271_p4 = scmp.lt.s32.totalorder (!%p228_p3), %s1392_s18, 11  ;;  %p1240_p5 = scmp.ne.s32.totalorder (!%p228_p3), %s1392_s18, 0 }
   0x7   : > { %231 = sbr.rel (%p228_p3) target bundleno = 383 (0x17f), region = 40 }
   0xc   : > { %s272_s22 = scalar_select %p271_p4, %s1392_s18, 11 }
   0xd   : > { %300 = sbr.rel (%p1240_p5) target bundleno = 20 (0x14), region = 44 }
   0xe   : > { %s1247_s23 = sshll.u32 %s272_s22, 7  ;;  %s1248_s24 = sshll.u32 %s272_s22, 8 }
   0xf   : > { %s1459_s27 = scalar_lea.vmem %s2016_s0, %s1247_s23  ;;  %s1464_s30 = scalar_lea.vmem %s2017_s1, %s1248_s24 }
  0x10   : > { %s1469_s8 = scalar_lea.vmem %s2018_s2, %s1248_s24 }
  0x12   : > { %v1402_v0 = vmov 0.0  }
  0x13   : > { %301 = vst [vmem:[#allocation2] sm:$0xff] %v1402_v0 }
  0x14 PF: > { %v766_v1 = vld [vmem:[%s1464_s30 + $0xf8] sm:$0xff]  ;;  %v765_v3 = vld [vmem:[%s1464_s30 + $0xf0] sm:$0xff]  ;;  %v764_v5 = vld [vmem:[%s1464_s30 + $0xe8] sm:$0xff]  ;;  %vm787_vm14 = vcmask 1043459   ;;  %vm789_vm13 = vcmask 1044484   ;;  %p1241_p6 = scmp.ne.s32.totalorder %s1392_s18, 11 }
  0x15   : > { %v750_v2 = vld [vmem:[%s1464_s30 + $0x78] sm:$0xff]  ;;  %1250 = vmatprep.subr.mxu0 %v766_v1  ;;  %v749_v4 = vld [vmem:[%s1464_s30 + $0x70] sm:$0xff]  ;;  %v748_v6 = vld [vmem:[%s1464_s30 + $0x68] sm:$0xff] }
  0x16   : > { %1251 = vmatpush3.msra.mxu0 %v750_v2  ;;  %v910_v7 = vld [vmem:[%s1469_s8 + $0xf8] sm:$0xff]  ;;  %v763_v9 = vld [vmem:[%s1464_s30 + $0xe0] sm:$0xff]  ;;  %v909_v10 = vld [vmem:[%s1469_s8 + $0xf0] sm:$0xff] }
  0x17   : > { %1252 = vmatprep.subr.mxu0 %v765_v3  ;;  %v894_v8 = vld [vmem:[%s1469_s8 + $0x78] sm:$0xff]  ;;  %1285 = vmatprep.subr.mxu1 %v910_v7  ;;  %v747_v11 = vld [vmem:[%s1464_s30 + $0x60] sm:$0xff]  ;;  %v893_v12 = vld [vmem:[%s1469_s8 + $0x70] sm:$0xff] }
  0x18   : > { %1253 = vmatpush3.msra.mxu0 %v749_v4  ;;  %1286 = vmatpush3.msra.mxu1 %v894_v8  ;;  %v908_v13 = vld [vmem:[%s1469_s8 + $0xe8] sm:$0xff]  ;;  %v762_v14 = vld [vmem:[%s1464_s30 + $0xd8] sm:$0xff]  ;;  %v907_v17 = vld [vmem:[%s1469_s8 + $0xe0] sm:$0xff] }
  0x19   : > { %1254 = vmatprep.subr.mxu0 %v764_v5  ;;  %1287 = vmatprep.subr.mxu1 %v909_v10  ;;  %v892_v15 = vld [vmem:[%s1469_s8 + $0x68] sm:$0xff]  ;;  %v746_v16 = vld [vmem:[%s1464_s30 + $0x58] sm:$0xff]  ;;  %v761_v18 = vld [vmem:[%s1464_s30 + $0xd0] sm:$0xff] }
  0x1a   : > { %1255 = vmatpush3.msra.mxu0 %v748_v6  ;;  %1288 = vmatpush3.msra.mxu1 %v893_v12  ;;  %v891_v19 = vld [vmem:[%s1469_s8 + $0x60] sm:$0xff]  ;;  %v745_v20 = vld [vmem:[%s1464_s30 + $0x50] sm:$0xff]  ;;  %v906_v21 = vld [vmem:[%s1469_s8 + $0xd8] sm:$0xff] }
  0x1b   : > { %1256 = vmatprep.subr.mxu0 %v763_v9  ;;  %1289 = vmatprep.subr.mxu1 %v908_v13  ;;  %v760_v22 = vld [vmem:[%s1464_s30 + $0xc8] sm:$0xff]  ;;  %v890_v23 = vld [vmem:[%s1469_s8 + $0x58] sm:$0xff]  ;;  %v905_v25 = vld [vmem:[%s1469_s8 + $0xd0] sm:$0xff] }
  0x1c   : > { %1257 = vmatpush3.msra.mxu0 %v747_v11  ;;  %1290 = vmatpush3.msra.mxu1 %v892_v15  ;;  %v744_v24 = vld [vmem:[%s1464_s30 + $0x48] sm:$0xff]  ;;  %v759_v26 = vld [vmem:[%s1464_s30 + $0xc0] sm:$0xff]  ;;  %v889_v27 = vld [vmem:[%s1469_s8 + $0x50] sm:$0xff] }
  0x1d   : > { %1258 = vmatprep.subr.mxu0 %v762_v14  ;;  %1291 = vmatprep.subr.mxu1 %v907_v17  ;;  %v743_v28 = vld [vmem:[%s1464_s30 + $0x40] sm:$0xff]  ;;  %v904_v29 = vld [vmem:[%s1469_s8 + $0xc8] sm:$0xff]  ;;  %v758_v30 = vld [vmem:[%s1464_s30 + $0xb8] sm:$0xff] }
  0x1e   : > { %1259 = vmatpush3.msra.mxu0 %v746_v16  ;;  %1292 = vmatpush3.msra.mxu1 %v891_v19  ;;  %v888_v31 = vld [vmem:[%s1469_s8 + $0x48] sm:$0xff]  ;;  %v742_v32 = vld [vmem:[%s1464_s30 + $0x38] sm:$0xff]  ;;  %v757_v33 = vld [vmem:[%s1464_s30 + $0xb0] sm:$0xff] }
  0x1f   : > { %1260 = vmatprep.subr.mxu0 %v761_v18  ;;  %1293 = vmatprep.subr.mxu1 %v906_v21  ;;  %v903_v34 = vld [vmem:[%s1469_s8 + $0xc0] sm:$0xff]  ;;  %v741_v35 = vld [vmem:[%s1464_s30 + $0x30] sm:$0xff]  ;;  %v756_v36 = vld [vmem:[%s1464_s30 + $0xa8] sm:$0xff] }
  0x20   : > { %1261 = vmatpush3.msra.mxu0 %v745_v20  ;;  %1294 = vmatpush3.msra.mxu1 %v890_v23  ;;  %v887_v37 = vld [vmem:[%s1469_s8 + $0x40] sm:$0xff]  ;;  %v740_v38 = vld [vmem:[%s1464_s30 + $0x28] sm:$0xff]  ;;  %v902_v39 = vld [vmem:[%s1469_s8 + $0xb8] sm:$0xff] }
  0x21   : > { %1262 = vmatprep.subr.mxu0 %v760_v22  ;;  %1295 = vmatprep.subr.mxu1 %v905_v25  ;;  %v886_v40 = vld [vmem:[%s1469_s8 + $0x38] sm:$0xff]  ;;  %v901_v41 = vld [vmem:[%s1469_s8 + $0xb0] sm:$0xff]  ;;  %v755_v42 = vld [vmem:[%s1464_s30 + $0xa0] sm:$0xff] }
  0x22   : > { %1263 = vmatpush3.msra.mxu0 %v744_v24  ;;  %1296 = vmatpush3.msra.mxu1 %v889_v27  ;;  %v885_v43 = vld [vmem:[%s1469_s8 + $0x30] sm:$0xff]  ;;  %v1516_v44 = vld [vmem:[%s1459_s27 + $0x8] sm:$0xff]  ;;  %v1519_v45 = vld [vmem:[%s1459_s27 + $0x18] sm:$0xff] }
  0x23   : > { %1264 = vmatprep.subr.mxu0 %v759_v26  ;;  %1297 = vmatprep.subr.mxu1 %v904_v29  ;;  %v1522_v46 = vld [vmem:[%s1459_s27 + $0x28] sm:$0xff]  ;;  %v1525_v47 = vld [vmem:[%s1459_s27 + $0x38] sm:$0xff]  ;;  %v324_v49 = vrot.slane %v1516_v44, 4  ;;  %v336_v50 = vrot.slane %v1519_v45, 4  ;;  %v739_v57 = vld [vmem:[%s1464_s30 + $0x20] sm:$0xff] }
  0x24   : > { %1265 = vmatpush3.msra.mxu0 %v743_v28  ;;  %1298 = vmatpush3.msra.mxu1 %v888_v31  ;;  %v1528_v48 = vld [vmem:[%s1459_s27 + $0x48] sm:$0xff]  ;;  %v1533_v51 = vld [vmem:[%s1459_s27 + $0x58] sm:$0xff]  ;;  %v348_v54 = vrot.slane %v1522_v46, 4  ;;  %v360_v55 = vrot.slane %v1525_v47, 4  ;;  %v899_v6 = vld [vmem:[%s1469_s8 + $0xa0] sm:$0xff] }
  0x25   : > { %1266 = vmatprep.subr.mxu0 %v758_v30  ;;  %1299 = vmatprep.subr.mxu1 %v903_v34  ;;  %v1536_v52 = vld [vmem:[%s1459_s27 + $0x68] sm:$0xff]  ;;  %v1539_v53 = vld [vmem:[%s1459_s27 + $0x78] sm:$0xff]  ;;  %v372_v56 = vrot.slane %v1528_v48, 4  ;;  %v325_v59 = vadd.f32 %v324_v49, %v1516_v44  ;;  %v337_v60 = vadd.f32 %v336_v50, %v1519_v45  ;;  %v384_v61 = vrot.slane %v1533_v51, 4  ;;  %v753_v11 = vld [vmem:[%s1464_s30 + $0x90] sm:$0xff] }
  0x26   : > { %1267 = vmatpush3.msra.mxu0 %v742_v32  ;;  %1300 = vmatpush3.msra.mxu1 %v887_v37  ;;  %v900_v58 = vld [vmem:[%s1469_s8 + $0xa8] sm:$0xff]  ;;  %v396_v62 = vrot.slane %v1536_v52, 4  ;;  %v754_v63 = vld [vmem:[%s1464_s30 + $0x98] sm:$0xff]  ;;  %v349_v1 = vadd.f32 %v348_v54, %v1522_v46  ;;  %v361_v2 = vadd.f32 %v360_v55, %v1525_v47  ;;  %v408_v4 = vrot.slane %v1539_v53, 4  ;;  %v883_v16 = vld [vmem:[%s1469_s8 + $0x20] sm:$0xff] }
  0x27   : > { %1268 = vmatprep.subr.mxu0 %v757_v33  ;;  %1301 = vmatprep.subr.mxu1 %v902_v39  ;;  %v884_v0 = vld [vmem:[%s1469_s8 + $0x28] sm:$0xff]  ;;  %v373_v3 = vadd.f32 %v372_v56, %v1528_v48  ;;  %v738_v5 = vld [vmem:[%s1464_s30 + $0x18] sm:$0xff]  ;;  %v326_v7 = vrot.slane %v325_v59, 2  ;;  %v338_v8 = vrot.slane %v337_v60, 2  ;;  %v385_v9 = vadd.f32 %v384_v61, %v1533_v51  ;;  %v737_v17 = vld [vmem:[%s1464_s30 + $0x10] sm:$0xff] }
  0x28   : > { %1269 = vmatpush3.msra.mxu0 %v741_v35  ;;  %1302 = vmatpush3.msra.mxu1 %v886_v40  ;;  %v397_v10 = vadd.f32 %v396_v62, %v1536_v52  ;;  %v350_v12 = vrot.slane %v349_v1, 2  ;;  %v362_v13 = vrot.slane %v361_v2, 2  ;;  %v409_v15 = vadd.f32 %v408_v4, %v1539_v53  ;;  %v898_v22 = vld [vmem:[%s1469_s8 + $0x98] sm:$0xff]  ;;  %v752_v23 = vld [vmem:[%s1464_s30 + $0x88] sm:$0xff]  ;;  %v897_v34 = vld [vmem:[%s1469_s8 + $0x90] sm:$0xff] }
  0x29   : > { %1270 = vmatprep.subr.mxu0 %v756_v36  ;;  %1303 = vmatprep.subr.mxu1 %v901_v41  ;;  %v374_v14 = vrot.slane %v373_v3, 2  ;;  %v327_v18 = vadd.f32 %v326_v7, %v325_v59  ;;  %v339_v19 = vadd.f32 %v338_v8, %v337_v60  ;;  %v386_v20 = vrot.slane %v385_v9, 2  ;;  %v882_v28 = vld [vmem:[%s1469_s8 + $0x18] sm:$0xff]  ;;  %v736_v29 = vld [vmem:[%s1464_s30 + $0x8] sm:$0xff]  ;;  %v751_v35 = vld [vmem:[%s1464_s30 + $0x80] sm:$0xff] }
  0x2a   : > { %1271 = vmatpush3.msra.mxu0 %v740_v38  ;;  %1304 = vmatpush3.msra.mxu1 %v885_v43  ;;  %v398_v21 = vrot.slane %v397_v10, 2  ;;  %v351_v24 = vadd.f32 %v350_v12, %v349_v1  ;;  %v363_v25 = vadd.f32 %v362_v13, %v361_v2  ;;  %v410_v27 = vrot.slane %v409_v15, 2  ;;  %v881_v40 = vld [vmem:[%s1469_s8 + $0x10] sm:$0xff]  ;;  %v735_v41 = vld [vmem:[%s1464_s30] sm:$0xff]  ;;  %v896_v54 = vld [vmem:[%s1469_s8 + $0x88] sm:$0xff] }
  0x2b   : > { %1272 = vmatprep.subr.mxu0 %v755_v42  ;;  %1305 = vmatprep.subr.mxu1 %v900_v58  ;;  %v375_v26 = vadd.f32 %v374_v14, %v373_v3  ;;  %v328_v30 = vrot.slane %v327_v18, 1  ;;  %v340_v31 = vrot.slane %v339_v19, 1  ;;  %v387_v32 = vadd.f32 %v386_v20, %v385_v9  ;;  %v880_v59 = vld [vmem:[%s1469_s8 + $0x8] sm:$0xff] }
  0x2c   : > { %1273 = vmatpush3.msra.mxu0 %v739_v57  ;;  %1306 = vmatpush3.msra.mxu1 %v884_v0  ;;  %v399_v33 = vadd.f32 %v398_v21, %v397_v10  ;;  %v352_v36 = vrot.slane %v351_v24, 1  ;;  %v364_v37 = vrot.slane %v363_v25, 1  ;;  %v411_v39 = vadd.f32 %v410_v27, %v409_v15  ;;  %v895_v0 = vld [vmem:[%s1469_s8 + $0x80] sm:$0xff] }
  0x2d   : > { %1274 = vmatprep.subr.mxu0 %v754_v63  ;;  %1307 = vmatprep.subr.mxu1 %v899_v6  ;;  %v376_v38 = vrot.slane %v375_v26, 1  ;;  %v329_v42 = vadd.f32 %v328_v30, %v327_v18  ;;  %v341_v43 = vadd.f32 %v340_v31, %v339_v19  ;;  %v388_v49 = vrot.slane %v387_v32, 1 }
  0x2e   : > { %1275 = vmatpush3.msra.mxu0 %v738_v5  ;;  %1308 = vmatpush3.msra.mxu1 %v883_v16  ;;  %v400_v50 = vrot.slane %v399_v33, 1  ;;  %v353_v55 = vadd.f32 %v352_v36, %v351_v24  ;;  %v365_v56 = vadd.f32 %v364_v37, %v363_v25  ;;  %v412_v58 = vrot.slane %v411_v39, 1  ;;  %v879_v5 = vld [vmem:[%s1469_s8] sm:$0xff] }
  0x2f   : > { %1276 = vmatprep.subr.mxu0 %v753_v11  ;;  %1309 = vmatprep.subr.mxu1 %v898_v22  ;;  %v377_v57 = vadd.f32 %v376_v38, %v375_v26  ;;  %v389_v60 = vadd.f32 %v388_v49, %v387_v32  ;;  %v1574_v62 = vmul.f32 0.125, %v329_v42  ;;  %v1576_v63 = vmul.f32 0.125, %v341_v43 }
  0x30   : > { %1277 = vmatpush3.msra.mxu0 %v737_v17  ;;  %1310 = vmatpush3.msra.mxu1 %v882_v28  ;;  %v401_v61 = vadd.f32 %v400_v50, %v399_v33  ;;  %v413_v1 = vadd.f32 %v412_v58, %v411_v39  ;;  %v1579_v2 = vmul.f32 0.125, %v353_v55  ;;  %v1581_v3 = vmul.f32 0.125, %v365_v56 }
  0x31   : > { %1278 = vmatprep.subr.mxu0 %v752_v23  ;;  %1311 = vmatprep.subr.mxu1 %v897_v34  ;;  %v1583_v4 = vmul.f32 0.125, %v377_v57  ;;  %v1586_v6 = vmul.f32 0.125, %v389_v60  ;;  %v431_v8 = vsub.f32 %v1516_v44, %v1574_v62  ;;  %v433_v9 = vsub.f32 %v1519_v45, %v1576_v63 }
  0x32   : > { %1279 = vmatpush3.msra.mxu0 %v736_v29  ;;  %1312 = vmatpush3.msra.mxu1 %v881_v40  ;;  %v1588_v7 = vmul.f32 0.125, %v401_v61  ;;  %v1594_v10 = vmul.f32 0.125, %v413_v1  ;;  %v435_v11 = vsub.f32 %v1522_v46, %v1579_v2  ;;  %v437_v12 = vsub.f32 %v1525_v47, %v1581_v3 }
  0x33   : > { %1280 = vmatprep.subr.mxu0 %v751_v35  ;;  %1313 = vmatprep.subr.mxu1 %v896_v54  ;;  %v439_v13 = vsub.f32 %v1528_v48, %v1583_v4  ;;  %v441_v14 = vsub.f32 %v1533_v51, %v1586_v6  ;;  %v447_v45 = vmul.f32 %v431_v8, %v431_v8 }
  0x34   : > { %1281 = vmatpush3.msra.mxu0 %v735_v41  ;;  %1314 = vmatpush3.msra.mxu1 %v880_v59  ;;  %v443_v44 = vsub.f32 %v1536_v52, %v1588_v7  ;;  %v449_v15 = vmul.f32 %v433_v9, %v433_v9  ;;  %v445_v16 = vsub.f32 %v1539_v53, %v1594_v10 }
  0x35   : > { %1315 = vmatprep.subr.mxu1 %v895_v0  ;;  %v451_v46 = vmul.f32 %v435_v11, %v435_v11  ;;  %v453_v17 = vmul.f32 %v437_v12, %v437_v12  ;;  %v455_v18 = vmul.f32 %v439_v13, %v439_v13  ;;  %v457_v47 = vmul.f32 %v441_v14, %v441_v14 }
  0x36   : > { %1316 = vmatpush3.msra.mxu1 %v879_v5  ;;  %v459_v19 = vmul.f32 %v443_v44, %v443_v44  ;;  %v468_v20 = vrot.slane %v447_v45, 4  ;;  %v480_v48 = vrot.slane %v449_v15, 4  ;;  %v461_v21 = vmul.f32 %v445_v16, %v445_v16 }
  0x37   : > { %v492_v22 = vrot.slane %v451_v46, 4  ;;  %v504_v23 = vrot.slane %v453_v17, 4  ;;  %v516_v51 = vrot.slane %v455_v18, 4  ;;  %v528_v52 = vrot.slane %v457_v47, 4 }
  0x38   : > { %v469_v24 = vadd.f32 %v468_v20, %v447_v45  ;;  %v481_v25 = vadd.f32 %v480_v48, %v449_v15  ;;  %v540_v26 = vrot.slane %v459_v19, 4  ;;  %v552_v30 = vrot.slane %v461_v21, 4 }
  0x39   : > { %v493_v27 = vadd.f32 %v492_v22, %v451_v46  ;;  %v505_v28 = vadd.f32 %v504_v23, %v453_v17  ;;  %v517_v29 = vadd.f32 %v516_v51, %v455_v18  ;;  %v529_v32 = vadd.f32 %v528_v52, %v457_v47 }
  0x3a   : > { %v470_v53 = vrot.slane %v469_v24, 2  ;;  %v482_v31 = vrot.slane %v481_v25, 2  ;;  %v541_v33 = vadd.f32 %v540_v26, %v459_v19  ;;  %v553_v37 = vadd.f32 %v552_v30, %v461_v21  ;;  %v1632_v26 = vld [vmem:[%s1459_s27] sm:$0xff] }
  0x3b   : > { %v494_v34 = vrot.slane %v493_v27, 2  ;;  %v506_v35 = vrot.slane %v505_v28, 2  ;;  %v518_v36 = vrot.slane %v517_v29, 2  ;;  %v530_v40 = vrot.slane %v529_v32, 2  ;;  %v1643_v30 = vld [vmem:[%s1459_s27 + $0x20] sm:$0xff] }
  0x3c   : > { %v471_v38 = vadd.f32 %v470_v53, %v469_v24  ;;  %v483_v39 = vadd.f32 %v482_v31, %v481_v25  ;;  %v542_v41 = vrot.slane %v541_v33, 2  ;;  %v554_v50 = vrot.slane %v553_v37, 2  ;;  %v1646_v53 = vld [vmem:[%s1459_s27 + $0x30] sm:$0xff]  ;;  %v1649_v31 = vld [vmem:[%s1459_s27 + $0x40] sm:$0xff] }
  0x3d   : > { %v495_v42 = vadd.f32 %v494_v34, %v493_v27  ;;  %v507_v43 = vadd.f32 %v506_v35, %v505_v28  ;;  %v519_v49 = vadd.f32 %v518_v36, %v517_v29  ;;  %v531_v56 = vadd.f32 %v530_v40, %v529_v32  ;;  %v1635_v27 = vld [vmem:[%s1459_s27 + $0x10] sm:$0xff]  ;;  %v1661_v36 = vld [vmem:[%s1459_s27 + $0x60] sm:$0xff] }
  0x3e   : > { %v472_v54 = vrot.slane %v471_v38, 1  ;;  %v484_v55 = vrot.slane %v483_v39, 1  ;;  %v543_v57 = vadd.f32 %v542_v41, %v541_v33  ;;  %v555_v61 = vadd.f32 %v554_v50, %v553_v37  ;;  %v1658_v35 = vld [vmem:[%s1459_s27 + $0x50] sm:$0xff] }
  0x3f   : > { %v496_v58 = vrot.slane %v495_v42, 1  ;;  %v508_v59 = vrot.slane %v507_v43, 1  ;;  %v520_v60 = vrot.slane %v519_v49, 1  ;;  %v532_v5 = vrot.slane %v531_v56, 1  ;;  %v1664_v37 = vld [vmem:[%s1459_s27 + $0x70] sm:$0xff] }
  0x40   : > { %v473_v0 = vadd.f32 %v472_v54, %v471_v38  ;;  %v485_v1 = vadd.f32 %v484_v55, %v483_v39  ;;  %v544_v8 = vrot.slane %v543_v57, 1  ;;  %v556_v13 = vrot.slane %v555_v61, 1 }
  0x41   : > { %v497_v9 = vadd.f32 %v496_v58, %v495_v42  ;;  %v509_v11 = vadd.f32 %v508_v59, %v507_v43  ;;  %v521_v12 = vadd.f32 %v520_v60, %v519_v49  ;;  %v533_v14 = vadd.f32 %v532_v5, %v531_v56 }
  0x42   : > { %v545_v44 = vadd.f32 %v544_v8, %v543_v57  ;;  %v559_v45 = vadd.f32 2.3e-08, %v473_v0  ;;  %v561_v15 = vadd.f32 2.3e-08, %v485_v1  ;;  %v557_v16 = vadd.f32 %v556_v13, %v555_v61 }
  0x43   : > { %v563_v46 = vadd.f32 2.3e-08, %v497_v9  ;;  %v565_v17 = vadd.f32 2.3e-08, %v509_v11  ;;  %v567_v18 = vadd.f32 2.3e-08, %v521_v12 }
  0x44   : > { %v569_v47 = vadd.f32 2.3e-08, %v533_v14  ;;  %v571_v19 = vadd.f32 2.3e-08, %v545_v44  ;;  %v1608_v20 = vmul.f32 0.125, %v559_v45  ;;  %v1610_v48 = vmul.f32 0.125, %v561_v15 }
  0x45   : > { %v573_v21 = vadd.f32 2.3e-08, %v557_v16  ;;  %v1612_v22 = vmul.f32 0.125, %v563_v46  ;;  %v1614_v23 = vmul.f32 0.125, %v565_v17  ;;  %v1616_v51 = vmul.f32 0.125, %v567_v18 }
  0x46   : > { %1346 = vrsqrt.f32 %v1608_v20  ;;  %v1619_v24 = vmul.f32 0.125, %v569_v47  ;;  %v1622_v25 = vmul.f32 0.125, %v571_v19  ;;  %vm599_vm0 = vcmp.eq.f32.partialorder %v1608_v20, inf }
  0x47   : > { %1348 = vrsqrt.f32 %v1610_v48  ;;  %v1625_v52 = vmul.f32 0.125, %v573_v21  ;;  %vm601_vm1 = vcmp.eq.f32.partialorder %v1608_v20, 0.0  ;;  %v602_v28 = vand.u32 2147483648, %v1608_v20 }
  0x48   : > { %1350 = vrsqrt.f32 %v1612_v22  ;;  %vm613_vm2 = vcmp.eq.f32.partialorder %v1610_v48, inf  ;;  %v616_v29 = vand.u32 2147483648, %v1610_v48  ;;  %vm615_vm3 = vcmp.eq.f32.partialorder %v1610_v48, 0.0 }
  0x49   : > { %1352 = vrsqrt.f32 %v1614_v23  ;;  %vm627_vm4 = vcmp.eq.f32.partialorder %v1612_v22, inf  ;;  %v630_v32 = vand.u32 2147483648, %v1612_v22  ;;  %v644_v33 = vand.u32 2147483648, %v1614_v23 }
  0x4a   : > { %1354 = vrsqrt.f32 %v1616_v51  ;;  %v658_v34 = vand.u32 2147483648, %v1616_v51  ;;  %vm629_vm5 = vcmp.eq.f32.partialorder %v1612_v22, 0.0  ;;  %vm641_vm6 = vcmp.eq.f32.partialorder %v1614_v23, inf }
  0x4b   : > { %1356 = vrsqrt.f32 %v1619_v24  ;;  %v672_v38 = vand.u32 2147483648, %v1619_v24  ;;  %v686_v39 = vand.u32 2147483648, %v1622_v25  ;;  %v700_v40 = vand.u32 2147483648, %v1625_v52 }
  0x4c   : > { %1358 = vrsqrt.f32 %v1622_v25  ;;  %v318_v41 = vrot.slane %v1632_v26, 4  ;;  %vm643_vm7 = vcmp.eq.f32.partialorder %v1614_v23, 0.0  ;;  %vm655_vm8 = vcmp.eq.f32.partialorder %v1616_v51, inf }
  0x4d   : > { %1360 = vrsqrt.f32 %v1625_v52  ;;  %v330_v42 = vrot.slane %v1635_v27, 4  ;;  %v342_v43 = vrot.slane %v1643_v30, 4  ;;  %v354_v49 = vrot.slane %v1646_v53, 4 }
  0x4e   : > { %v366_v50 = vrot.slane %v1649_v31, 4  ;;  %vm657_vm9 = vcmp.eq.f32.partialorder %v1616_v51, 0.0  ;;  %vm669_vm10 = vcmp.eq.f32.partialorder %v1619_v24, inf  ;;  %v319_v54 = vadd.f32 %v318_v41, %v1632_v26 }
  0x4f   : > { %v378_v55 = vrot.slane %v1658_v35, 4  ;;  %v390_v56 = vrot.slane %v1661_v36, 4  ;;  %v402_v57 = vrot.slane %v1664_v37, 4  ;;  %vm671_vm11 = vcmp.eq.f32.partialorder %v1619_v24, 0.0 }
  0x50   : > { %vm683_vm12 = vcmp.eq.f32.partialorder %v1622_v25, inf  ;;  %v331_v58 = vadd.f32 %v330_v42, %v1635_v27  ;;  %v343_v59 = vadd.f32 %v342_v43, %v1643_v30  ;;  %v355_v60 = vadd.f32 %v354_v49, %v1646_v53 }
  0x51   : > { %v367_v61 = vadd.f32 %v366_v50, %v1649_v31  ;;  %v320_v0 = vrot.slane %v319_v54, 2  ;;  %v1693_v1 = vadd.f32 %v378_v55, %v1658_v35  ;;  %v1696_v5 = vadd.f32 %v390_v56, %v1661_v36 }
  0x52   : > { %v1699_v8 = vadd.f32 %v402_v57, %v1664_v37  ;;  %vm699_vm15 = vcmp.eq.f32.partialorder %v1625_v52, 0.0  ;;  %v332_v11 = vrot.slane %v331_v58, 2  ;;  %v344_v12 = vrot.slane %v343_v59, 2 }
  0x53   : > { %v1347_v9 = vpop.eup %1346  ;;  %v356_v13 = vrot.slane %v355_v60, 2  ;;  %v368_v14 = vrot.slane %v367_v61, 2  ;;  %v321_v15 = vadd.f32 %v320_v0, %v319_v54  ;;  %v380_v16 = vrot.slane %v1693_v1, 2 }
  0x54   : > { %v1349_v44 = vpop.eup %1348  ;;  %v598_v45 = vmul.f32 %v1347_v9, %v1608_v20  ;;  %v392_v46 = vrot.slane %v1696_v5, 2  ;;  %v333_v47 = vadd.f32 %v332_v11, %v331_v58  ;;  %v1706_v19 = vadd.f32 %v344_v12, %v343_v59 }
  0x55   : > { %v1351_v17 = vpop.eup %1350  ;;  %v612_v18 = vmul.f32 %v1349_v44, %v1610_v48  ;;  %v1708_v21 = vadd.f32 %v356_v13, %v355_v60  ;;  %v322_v49 = vrot.slane %v321_v15, 1  ;;  %v1714_v50 = vadd.f32 %v368_v14, %v367_v61 }
  0x56   : > { %v1353_v41 = vpop.eup %1352  ;;  %v600_v42 = vsel %vm599_vm0, %v1608_v20, %v598_v45  ;;  %v626_v43 = vmul.f32 %v1351_v17, %v1612_v22  ;;  %v334_v58 = vrot.slane %v333_v47, 1  ;;  %vm2023_vm0 = vcmask 1045509  }
  0x57   : > { %v1355_v54 = vpop.eup %1354  ;;  %v603_v55 = vsel %vm601_vm1, %v602_v28, %v600_v42  ;;  %v614_v56 = vsel %vm613_vm2, %v1610_v48, %v612_v18  ;;  %v640_v57 = vmul.f32 %v1353_v41, %v1614_v23  ;;  %vm2022_vm1 = vcmask 1046534  }
  0x58   : > { %v1357_v59 = vpop.eup %1356  ;;  %v617_v60 = vsel %vm615_vm3, %v616_v29, %v614_v56  ;;  %v628_v61 = vsel %vm627_vm4, %v1612_v22, %v626_v43  ;;  %v654_v20 = vmul.f32 %v1355_v54, %v1616_v51  ;;  %v703_v28 = vadd.f32 %v603_v55, %v1574_v62 }
  0x59   : > { %v1359_v0 = vpop.eup %1358  ;;  %v631_v9 = vsel %vm629_vm5, %v630_v32, %v628_v61  ;;  %v642_v48 = vsel %vm641_vm6, %v1614_v23, %v640_v57  ;;  %v668_v29 = vmul.f32 %v1357_v59, %v1619_v24  ;;  %v705_v11 = vadd.f32 %v617_v60, %v1576_v63 }
  0x5a   : > { %v1361_v12 = vpop.eup %1360  ;;  %v645_v13 = vsel %vm643_vm7, %v644_v33, %v642_v48  ;;  %v656_v22 = vsel %vm655_vm8, %v1616_v51, %v654_v20  ;;  %v682_v32 = vmul.f32 %v1359_v0, %v1622_v25  ;;  %v707_v14 = vadd.f32 %v631_v9, %v1579_v2 }
  0x5b   : > { %vm2024_vm2 = vcmask 1047559   ;;  %v659_v44 = vsel %vm657_vm9, %v658_v34, %v656_v22  ;;  %v670_v45 = vsel %vm669_vm10, %v1619_v24, %v668_v29  ;;  %v696_v23 = vmul.f32 %v1361_v12, %v1625_v52 }
  0x5c   : > { %v709_v33 = vadd.f32 %v645_v13, %v1581_v3  ;;  %v673_v17 = vsel %vm671_vm11, %v672_v38, %v670_v45  ;;  %v684_v18 = vsel %vm683_vm12, %v1622_v25, %v682_v32  ;;  %v711_v51 = vadd.f32 %v659_v44, %v1583_v4 }
  0x5d   : > { %v719_v34 = vmul.f32 0.5, %v703_v28  ;;  %vm2025_vm3 = vcmp.eq.f32.partialorder %v1622_v25, 0.0  ;;  %vm2026_vm4 = vcmp.eq.f32.partialorder %v1625_v52, inf  ;;  %v713_v43 = vadd.f32 %v673_v17, %v1586_v6 }
  0x5e   : > { %v687_v41 = vsel %vm2025_vm3, %v686_v39, %v684_v18  ;;  %v698_v42 = vsel %vm2026_vm4, %v1625_v52, %v696_v23  ;;  %v721_v24 = vmul.f32 0.5, %v705_v11  ;;  %v723_v55 = vmul.f32 0.5, %v707_v14 }
  0x5f   : > { %v701_v38 = vsel %vm699_vm15, %v700_v40, %v698_v42  ;;  %v715_v54 = vadd.f32 %v687_v41, %v1588_v7  ;;  %v725_v56 = vmul.f32 0.5, %v709_v33  ;;  %v727_v25 = vmul.f32 0.5, %v711_v51 }
  0x60   : > { %v717_v57 = vadd.f32 %v701_v38, %v1594_v10  ;;  %v729_v39 = vmul.f32 0.5, %v713_v43  ;;  %vm2027_vm5 = vcmask 1041409   ;;  %vm2028_vm6 = vcmask 1042434  }
  0x61   : > { %v797_v59 = vsel %vm2027_vm5, %v721_v24, %v719_v34  ;;  %v731_v60 = vmul.f32 0.5, %v715_v54  ;;  %v323_v20 = vadd.f32 %v322_v49, %v321_v15  ;;  %v335_v28 = vadd.f32 %v334_v58, %v333_v47  ;;  %vm2029_vm12 = vmmov %vm2027_vm5 }
  0x62   : > { %v798_v61 = vsel %vm2028_vm6, %v723_v55, %v797_v59  ;;  %v733_v0 = vmul.f32 0.5, %v717_v57  ;;  %v346_v52 = vrot.slane %v1706_v19, 1  ;;  %v358_v40 = vrot.slane %v1708_v21, 1  ;;  %vm2030_vm15 = vmmov %vm2027_vm5 }
  0x63   : > { %v799_v9 = vsel %vm787_vm14, %v725_v56, %v798_v61  ;;  %v370_v29 = vrot.slane %v1714_v50, 1  ;;  %v381_v11 = vadd.f32 %v380_v16, %v1693_v1  ;;  %v393_v15 = vadd.f32 %v392_v46, %v1696_v5  ;;  %vm2031_vm4 = vmmov %vm2028_vm6 }
  0x64   : > { %v800_v48 = vsel %vm789_vm13, %v727_v25, %v799_v9  ;;  %v347_v49 = vadd.f32 %v346_v52, %v1706_v19  ;;  %v359_v58 = vadd.f32 %v358_v40, %v1708_v21  ;;  %v404_v12 = vrot.slane %v1699_v8, 2  ;;  %vm2032_vm5 = vmmov %vm2031_vm4 }
  0x65   : > { %v801_v47 = vsel %vm2023_vm0, %v729_v39, %v800_v48  ;;  %v371_v22 = vadd.f32 %v370_v29, %v1714_v50  ;;  %v382_v32 = vrot.slane %v381_v11, 1  ;;  %v394_v14 = vrot.slane %v393_v15, 1 }
  0x66   : > { %v802_v13 = vsel %vm2022_vm1, %v731_v60, %v801_v47  ;;  %v405_v16 = vadd.f32 %v404_v12, %v1699_v8  ;;  %v1803_v44 = vmul.f32 0.125, %v323_v20  ;;  %v1805_v5 = vmul.f32 0.125, %v335_v28 }
  0x67   : > { %v803_v1 = vsel %vm2024_vm2, %v733_v0, %v802_v13  ;;  %v383_v46 = vadd.f32 %v382_v32, %v381_v11  ;;  %v395_v19 = vadd.f32 %v394_v14, %v393_v15  ;;  %v1807_v21 = vmul.f32 0.125, %v347_v49 }
  0x68   : > { %870 = vmatprep.mubr.f32.mxu0 %v803_v1  ;;  %v1809_v45 = vmul.f32 0.125, %v359_v58  ;;  %v406_v23 = vrot.slane %v405_v16, 1  ;;  %v1811_v33 = vmul.f32 0.125, %v371_v22  ;;  %v430_v50 = vsub.f32 %v1632_v26, %v1803_v44 }
  0x69   : > { %v432_v8 = vsub.f32 %v1635_v27, %v1805_v5  ;;  %v1817_v17 = vmul.f32 0.125, %v383_v46  ;;  %v1819_v18 = vmul.f32 0.125, %v395_v19  ;;  %v434_v51 = vsub.f32 %v1643_v30, %v1807_v21 }
  0x6a   : > { %v436_v34 = vsub.f32 %v1646_v53, %v1809_v45  ;;  %v407_v41 = vadd.f32 %v406_v23, %v405_v16  ;;  %v438_v42 = vsub.f32 %v1649_v31, %v1811_v33  ;;  %v446_v43 = vmul.f32 %v430_v50, %v430_v50 }
  0x6b   : > { %v448_v24 = vmul.f32 %v432_v8, %v432_v8  ;;  %v440_v26 = vsub.f32 %v1658_v35, %v1817_v17  ;;  %v442_v27 = vsub.f32 %v1661_v36, %v1819_v18  ;;  %v450_v38 = vmul.f32 %v434_v51, %v434_v51 }
  0x6c   : > { %v452_v54 = vmul.f32 %v436_v34, %v436_v34  ;;  %v1831_v55 = vmul.f32 0.125, %v407_v41  ;;  %v454_v30 = vmul.f32 %v438_v42, %v438_v42  ;;  %v462_v56 = vrot.slane %v446_v43, 4 }
  0x6d   : > { %v474_v57 = vrot.slane %v448_v24, 4  ;;  %v456_v53 = vmul.f32 %v440_v26, %v440_v26  ;;  %v458_v25 = vmul.f32 %v442_v27, %v442_v27  ;;  %v486_v39 = vrot.slane %v450_v38, 4 }
  0x6e   : > { %v498_v59 = vrot.slane %v452_v54, 4  ;;  %v444_v31 = vsub.f32 %v1664_v37, %v1831_v55  ;;  %v463_v60 = vadd.f32 %v462_v56, %v446_v43  ;;  %v510_v35 = vrot.slane %v454_v30, 4 }
  0x6f   : > { %v475_v61 = vadd.f32 %v474_v57, %v448_v24  ;;  %v487_v20 = vadd.f32 %v486_v39, %v450_v38  ;;  %v522_v36 = vrot.slane %v456_v53, 4  ;;  %v534_v0 = vrot.slane %v458_v25, 4 }
  0x70   : > { %v499_v28 = vadd.f32 %v498_v59, %v452_v54  ;;  %v460_v9 = vmul.f32 %v444_v31, %v444_v31  ;;  %v464_v52 = vrot.slane %v463_v60, 2  ;;  %v511_v48 = vadd.f32 %v510_v35, %v454_v30 }
  0x71   : > { %v476_v40 = vrot.slane %v475_v61, 2  ;;  %v488_v29 = vrot.slane %v487_v20, 2  ;;  %v523_v15 = vadd.f32 %v522_v36, %v456_v53  ;;  %v535_v47 = vadd.f32 %v534_v0, %v458_v25 }
  0x72   : > { %v500_v11 = vrot.slane %v499_v28, 2  ;;  %v465_v49 = vadd.f32 %v464_v52, %v463_v60  ;;  %v512_v12 = vrot.slane %v511_v48, 2  ;;  %v546_v13 = vrot.slane %v460_v9, 4 }
  0x73   : > { %v477_v58 = vadd.f32 %v476_v40, %v475_v61  ;;  %v489_v37 = vadd.f32 %v488_v29, %v487_v20  ;;  %v524_v32 = vrot.slane %v523_v15, 2  ;;  %v536_v14 = vrot.slane %v535_v47, 2 }
  0x74   : > { %v501_v22 = vadd.f32 %v500_v11, %v499_v28  ;;  %v466_v1 = vrot.slane %v465_v49, 1  ;;  %v513_v46 = vadd.f32 %v512_v12, %v511_v48  ;;  %v547_v19 = vadd.f32 %v546_v13, %v460_v9 }
  0x75   : > { %v478_v16 = vrot.slane %v477_v58, 1  ;;  %v490_v23 = vrot.slane %v489_v37, 1  ;;  %v525_v8 = vadd.f32 %v524_v32, %v523_v15  ;;  %v537_v51 = vadd.f32 %v536_v14, %v535_v47 }
  0x76   : > { %v502_v50 = vrot.slane %v501_v22, 1  ;;  %v467_v34 = vadd.f32 %v466_v1, %v465_v49  ;;  %v514_v42 = vrot.slane %v513_v46, 1  ;;  %v548_v43 = vrot.slane %v547_v19, 2 }
  0x77   : > { %v479_v41 = vadd.f32 %v478_v16, %v477_v58  ;;  %v491_v24 = vadd.f32 %v490_v23, %v489_v37  ;;  %v526_v27 = vrot.slane %v525_v8, 1  ;;  %v538_v38 = vrot.slane %v537_v51, 1 }
  0x78   : > { %v503_v26 = vadd.f32 %v502_v50, %v501_v22  ;;  %v515_v54 = vadd.f32 %v514_v42, %v513_v46  ;;  %v549_v30 = vadd.f32 %v548_v43, %v547_v19  ;;  %v558_v56 = vadd.f32 2.3e-08, %v467_v34 }
  0x79   : > { %v560_v57 = vadd.f32 2.3e-08, %v479_v41  ;;  %v527_v53 = vadd.f32 %v526_v27, %v525_v8  ;;  %v539_v25 = vadd.f32 %v538_v38, %v537_v51  ;;  %v562_v39 = vadd.f32 2.3e-08, %v491_v24 }
  0x7a   : > { %v564_v59 = vadd.f32 2.3e-08, %v503_v26  ;;  %v550_v31 = vrot.slane %v549_v30, 1  ;;  %v566_v60 = vadd.f32 2.3e-08, %v515_v54  ;;  %v1835_v61 = vmul.f32 0.125, %v558_v56 }
  0x7b   : > { %v1837_v35 = vmul.f32 0.125, %v560_v57  ;;  %v568_v20 = vadd.f32 2.3e-08, %v527_v53  ;;  %v570_v28 = vadd.f32 2.3e-08, %v539_v25  ;;  %v1839_v36 = vmul.f32 0.125, %v562_v39 }
  0x7c   : > { %v551_v0 = vadd.f32 %v550_v31, %v549_v30  ;;  %v1841_v9 = vmul.f32 0.125, %v564_v59  ;;  %1362 = vrsqrt.f32 %v1835_v61  ;;  %v1844_v52 = vmul.f32 0.125, %v566_v60 }
  0x7d   : > { %v1846_v48 = vmul.f32 0.125, %v568_v20  ;;  %1364 = vrsqrt.f32 %v1837_v35  ;;  %v1849_v29 = vmul.f32 0.125, %v570_v28  ;;  %vm592_vm7 = vcmp.eq.f32.partialorder %v1835_v61, inf }
  0x7e   : > { %v572_v40 = vadd.f32 2.3e-08, %v551_v0  ;;  %1366 = vrsqrt.f32 %v1839_v36  ;;  %vm594_vm8 = vcmp.eq.f32.partialorder %v1835_v61, 0.0  ;;  %v595_v15 = vand.u32 2147483648, %v1835_v61 }
  0x7f   : > { %1368 = vrsqrt.f32 %v1841_v9  ;;  %vm606_vm9 = vcmp.eq.f32.partialorder %v1837_v35, inf  ;;  %vm608_vm10 = vcmp.eq.f32.partialorder %v1837_v35, 0.0  ;;  %v609_v47 = vand.u32 2147483648, %v1837_v35 }
  0x80   : > { %v1852_v11 = vmul.f32 0.125, %v572_v40  ;;  %1370 = vrsqrt.f32 %v1844_v52  ;;  %v934_v49 = vsel %vm2029_vm12, %v1576_v63, %v1574_v62  ;;  %v927_v58 = vsel %vm2030_vm15, %v1805_v5, %v1803_v44 }
  0x81   : > { %1372 = vrsqrt.f32 %v1846_v48  ;;  %vm622_vm3 = vcmp.eq.f32.partialorder %v1839_v36, 0.0  ;;  %v623_v12 = vand.u32 2147483648, %v1839_v36  ;;  %v935_v13 = vsel %vm2031_vm4, %v1579_v2, %v934_v49 }
  0x82   : > { %1374 = vrsqrt.f32 %v1849_v29  ;;  %v928_v37 = vsel %vm2032_vm5, %v1807_v21, %v927_v58  ;;  %vm634_vm6 = vcmp.eq.f32.partialorder %v1841_v9, inf  ;;  %vm636_vm11 = vcmp.eq.f32.partialorder %v1841_v9, 0.0 }
  0x83   : > { %1376 = vrsqrt.f32 %v1852_v11  ;;  %v936_v62 = vsel %vm787_vm14, %v1581_v3, %v935_v13  ;;  %v929_v63 = vsel %vm787_vm14, %v1809_v45, %v928_v37  ;;  %v637_v22 = vand.u32 2147483648, %v1841_v9 }
  0x84   : > { %vm648_vm12 = vcmp.eq.f32.partialorder %v1844_v52, inf  ;;  %v937_v2 = vsel %vm789_vm13, %v1583_v4, %v936_v62  ;;  %v930_v32 = vsel %vm789_vm13, %v1811_v33, %v929_v63  ;;  %vm650_vm15 = vcmp.eq.f32.partialorder %v1844_v52, 0.0 }
  0x85   : > { %v651_v1 = vand.u32 2147483648, %v1844_v52  ;;  %v938_v3 = vsel %vm2023_vm0, %v1586_v6, %v937_v2  ;;  %v931_v16 = vsel %vm2023_vm0, %v1817_v17, %v930_v32  ;;  %vm662_vm4 = vcmp.eq.f32.partialorder %v1846_v48, inf }
  0x86   : > { %v939_v4 = vsel %vm2022_vm1, %v1588_v7, %v938_v3  ;;  %v932_v19 = vsel %vm2022_vm1, %v1819_v18, %v931_v16  ;;  %vm664_vm5 = vcmp.eq.f32.partialorder %v1846_v48, 0.0  ;;  %v665_v50 = vand.u32 2147483648, %v1846_v48  ;;  %v734_v16 = vld [vmem:[#allocation2] sm:$0xff] }
  0x87   : > { %v940_v6 = vsel %vm2024_vm2, %v1594_v10, %v939_v4  ;;  %v933_v8 = vsel %vm2024_vm2, %v1831_v55, %v932_v19  ;;  %vm676_vm1 = vcmp.eq.f32.partialorder %v1849_v29, inf  ;;  %vm678_vm0 = vcmp.eq.f32.partialorder %v1849_v29, 0.0 }
  0x88   : > { %1007 = vmatprep.mubr.f32.mxu1 %v940_v6  ;;  %v679_v43 = vand.u32 2147483648, %v1849_v29  ;;  %vm690_vm2 = vcmp.eq.f32.partialorder %v1852_v11, inf  ;;  %v693_v38 = vand.u32 2147483648, %v1852_v11 }
  0x89   : > { %v1363_v14 = vpop.eup %1362  ;;  %1008 = vmatmul.mubr.f32.vlgmr.msra.gmra.mxu1 %v933_v8 }
  0x8a   : > { %v591_v46 = vmul.f32 %v1363_v14, %v1835_v61  ;;  %v1365_v23 = vpop.eup %1364 }
  0x8b   : > { %v1367_v51 = vpop.eup %1366  ;;  %v605_v7 = vmul.f32 %v1365_v23, %v1837_v35 }
  0x8c   : > { %v593_v34 = vsel %vm592_vm7, %v1835_v61, %v591_v46  ;;  %v1369_v41 = vpop.eup %1368  ;;  %v619_v10 = vmul.f32 %v1367_v51, %v1839_v36  ;;  %vm692_vm7 = vcmp.eq.f32.partialorder %v1852_v11, 0.0 }
  0x8d   : > { %v596_v42 = vsel %vm594_vm8, %v595_v15, %v593_v34  ;;  %v1371_v24 = vpop.eup %1370  ;;  %v607_v26 = vsel %vm606_vm9, %v1837_v35, %v605_v7  ;;  %v633_v27 = vmul.f32 %v1369_v41, %v1841_v9  ;;  %vm2033_vm8 = vcmp.eq.f32.partialorder %v1839_v36, inf }
  0x8e   : > { %v1373_v54 = vpop.eup %1372  ;;  %v610_v30 = vsel %vm608_vm10, %v609_v47, %v607_v26  ;;  %v621_v56 = vsel %vm2033_vm8, %v1839_v36, %v619_v10  ;;  %v647_v57 = vmul.f32 %v1371_v24, %v1844_v52  ;;  %v702_v53 = vadd.f32 %v596_v42, %v1803_v44 }
  0x8f   : > { %v1375_v25 = vpop.eup %1374  ;;  %v624_v39 = vsel %vm622_vm3, %v623_v12, %v621_v56  ;;  %v635_v59 = vsel %vm634_vm6, %v1841_v9, %v633_v27  ;;  %v661_v31 = vmul.f32 %v1373_v54, %v1846_v48  ;;  %v704_v60 = vadd.f32 %v610_v30, %v1805_v5 }
  0x90   : > { %v1377_v61 = vpop.eup %1376  ;;  %v638_v35 = vsel %vm636_vm11, %v637_v22, %v635_v59  ;;  %v649_v44 = vsel %vm648_vm12, %v1844_v52, %v647_v57  ;;  %v675_v20 = vmul.f32 %v1375_v25, %v1849_v29  ;;  %v706_v28 = vadd.f32 %v624_v39, %v1807_v21 }
  0x91   : > { %v652_v36 = vsel %vm650_vm15, %v651_v1, %v649_v44  ;;  %v663_v0 = vsel %vm662_vm4, %v1846_v48, %v661_v31  ;;  %v689_v5 = vmul.f32 %v1377_v61, %v1852_v11  ;;  %v708_v9 = vadd.f32 %v638_v35, %v1809_v45 }
  0x92   : > { %v666_v40 = vsel %vm664_vm5, %v665_v50, %v663_v0  ;;  %v677_v15 = vsel %vm676_vm1, %v1849_v29, %v675_v20  ;;  %v710_v21 = vadd.f32 %v652_v36, %v1811_v33  ;;  %v718_v47 = vmul.f32 0.5, %v702_v53 }
  0x93   : > { %v680_v52 = vsel %vm678_vm0, %v679_v43, %v677_v15  ;;  %v691_v49 = vsel %vm690_vm2, %v1852_v11, %v689_v5  ;;  %v712_v58 = vadd.f32 %v666_v40, %v1817_v17  ;;  %v720_v45 = vmul.f32 0.5, %v704_v60 }
  0x94   : > { %v694_v48 = vsel %vm692_vm7, %v693_v38, %v691_v49  ;;  %v714_v12 = vadd.f32 %v680_v52, %v1819_v18  ;;  %v722_v13 = vmul.f32 0.5, %v706_v28  ;;  %v724_v37 = vmul.f32 0.5, %v708_v9 }
  0x95   : > { %v716_v33 = vadd.f32 %v694_v48, %v1831_v55  ;;  %v726_v62 = vmul.f32 0.5, %v710_v21  ;;  %v728_v63 = vmul.f32 0.5, %v712_v58  ;;  %vm2034_vm1 = vcmask 1041409  }
  0x96   : > { %v784_v29 = vsel %vm2034_vm1, %v720_v45, %v718_v47  ;;  %v730_v22 = vmul.f32 0.5, %v714_v12  ;;  %vm2035_vm0 = vcmask 1042434   ;;  %vm2036_vm2 = vcmask 1045509  }
  0x97   : > { %v786_v2 = vsel %vm2035_vm0, %v722_v13, %v784_v29  ;;  %v732_v32 = vmul.f32 0.5, %v716_v33  ;;  %vm2037_vm9 = vcmask 1046534   ;;  %vm2038_vm10 = vcmask 1047559  }
  0x98   : > { %v788_v17 = vsel %vm787_vm14, %v724_v37, %v786_v2 }
  0x99   : > { %v790_v14 = vsel %vm789_vm13, %v726_v62, %v788_v17 }
  0x9a   : > { %v792_v11 = vsel %vm2036_vm2, %v728_v63, %v790_v14 }
  0x9b   : > { %v794_v18 = vsel %vm2037_vm9, %v730_v22, %v792_v11 }
  0x9c   : > { %v796_v1 = vsel %vm2038_vm10, %v732_v32, %v794_v18 }
  0x9d   : > { %871 = vmatmul.mubr.f32.vlgmr.msra.gmra.mxu0 %v796_v1 }
 0x149   : > { %v1317_v55 = vpop.f32.mrf.mxu1 }
 0x14b   : > { %v1318_v4 = vpop.f32.mrf.mxu1 }
 0x14c   : > { %v1319_v50 = vadd.f32 %v1318_v4, %v1317_v55 }
 0x15d   : > { %v1282_v3 = vpop.f32.mrf.mxu0 }
 0x15f   : > { %v1283_v46 = vpop.f32.mrf.mxu0 }
 0x160   : > { %v1284_v19 = vadd.f32 %v1283_v46, %v1282_v3 }
 0x162   : > { %v876_v23 = vadd.f32 %v1284_v19, %v734_v16  ;;  %1018 = sbr.rel (%p1241_p6) target bundleno = 383 (0x17f), region = 48 }
 0x164   : > { %v1013_v6 = vadd.f32 %v1319_v50, %v876_v23 }
 0x166   : > { %1014 = vst [vmem:[#allocation2] sm:$0xff] %v1013_v6 }
 0x167   : > { %v1242_v51 = vld [vmem:[%s2019_s3] ss:$0 sm:$0xff]  ;;  %v1034_v34 = vlaneseq  ;;  %v1403_v41 = vmov 1966171168  }
 0x168   : > { %v1032_v42 = vunpack.c.l.s4 %v1403_v41  ;;  %v1028_v25 = vld [vmem:[%s2020_s4] sm:$0xf] }
 0x169   : > { %v1035_v10 = vshrl.u32 %v1034_v34, 7 }
 0x16a   : > { %v1033_v43 = vunpack.c.0.s8 %v1032_v42 }
 0x16b   : > { %v1081_v38 = vsub.s32 0, %v1035_v10 }
 0x16c   : > { %v1036_v26 = vsub.s32 %v1033_v43, %v1035_v10 }
 0x16d   : > { %v1019_v8 = vld [vmem:[#allocation2] sm:$0xff] }
 0x16e   : > { %v1027_v7 = vadd.f32 %v1242_v51, %v1019_v8 }
 0x170   : > { %v1030_v24 = vcombine.high %v1027_v7, %v1027_v7  ;;  %v1037_v27 = vrot.slane %v1027_v7, %v1036_v26 }
 0x172   : > { %v1044_v54 = vrot.slane %v1030_v24, %v1036_v26  ;;  %v1053_v30 = vrot.slane %v1037_v27, %v1036_v26  ;;  %v1045_v56 = vcombine.high %v1037_v27, %v1037_v27 }
 0x174   : > { %v1060_v57 = vrot.slane %v1044_v54, %v1036_v26  ;;  %v1046_v53 = vcombine.high %v1044_v54, %v1044_v54  ;;  %v1082_v39 = vrot.slane %v1053_v30, %v1081_v38  ;;  %v1067_v59 = vrot.slane %v1045_v56, %v1036_v26 }
 0x175   : > { %v1075_v31 = vcombine.high %v1053_v30, %v1053_v30 }
 0x176   : > { %v1098_v60 = vrot.slane %v1060_v57, %v1081_v38  ;;  %v1074_v61 = vrot.slane %v1046_v53, %v1036_v26  ;;  %v1076_v35 = vcombine.high %v1060_v57, %v1060_v57  ;;  %v1119_v44 = vadd.f32 %v1082_v39, %v1028_v25 }
 0x177   : > { %v1086_v20 = vrot.slane %v1067_v59, %v1081_v38  ;;  %v1090_v28 = vrot.slane %v1075_v31, %v1081_v38  ;;  %v1077_v36 = vcombine.high %v1067_v59, %v1067_v59 }
 0x178   : > { %v1123_v0 = vadd.f32 %v1098_v60, %v1028_v25  ;;  %v1102_v5 = vrot.slane %v1074_v61, %v1081_v38  ;;  %v1106_v9 = vrot.slane %v1076_v35, %v1081_v38  ;;  %v1078_v40 = vcombine.high %v1074_v61, %v1074_v61  ;;  %1127 = vst [vmem:[%s2021_s5] sm:$0xf] %v1119_v44 }
 0x179   : > { %v1120_v15 = vadd.f32 %v1086_v20, %v1028_v25  ;;  %v1121_v21 = vadd.f32 %v1090_v28, %v1028_v25  ;;  %v1094_v47 = vrot.slane %v1077_v36, %v1081_v38 }
 0x17a   : > { %1131 = vst [vmem:[%s2021_s5 + $0x10] sm:$0xf] %v1123_v0  ;;  %v1124_v52 = vadd.f32 %v1102_v5, %v1028_v25  ;;  %v1125_v49 = vadd.f32 %v1106_v9, %v1028_v25  ;;  %v1110_v58 = vrot.slane %v1078_v40, %v1081_v38 }
 0x17b   : > { %1128 = vst [vmem:[%s2021_s5 + $0x4] sm:$0xf] %v1120_v15  ;;  %1129 = vst [vmem:[%s2021_s5 + $0x8] sm:$0xf] %v1121_v21  ;;  %v1122_v45 = vadd.f32 %v1094_v47, %v1028_v25 }
 0x17c   : > { %1132 = vst [vmem:[%s2021_s5 + $0x14] sm:$0xf] %v1124_v52  ;;  %1133 = vst [vmem:[%s2021_s5 + $0x18] sm:$0xf] %v1125_v49  ;;  %v1126_v48 = vadd.f32 %v1110_v58, %v1028_v25 }
 0x17d   : > { %1130 = vst [vmem:[%s2021_s5 + $0xc] sm:$0xf] %v1122_v45 }
 0x17e   : > { %1134 = vst [vmem:[%s2021_s5 + $0x1c] sm:$0xf] %v1126_v48 }
 0x17f PF: > { %s15_s20 = sadd.s32 1, %s1400_s20   ;;  %s2039_s18 = smov %s1396_s19 }
 0x180   : > { %p12_p7 = scmp.ge.s32.totalorder %s15_s20, 14   ;;  %s2040_s19 = smov %s2042_s21 }
 0x182   :  { %14 = sbr.rel (!%p12_p7) target bundleno = 2 (0x2), region = 84 }

</bundles_post_ra>
